<compile_context>
chip_gen: v7x
topology: tpu7x:2x2x1
jax: 0.10.0
libtpu: 0.0.40
codegen_flags: <defaults>
</compile_context>

<pallas_src>
import functools

import jax
import jax.numpy as jnp
from jax.experimental import pallas as pl
from jax.experimental.pallas import tpu as pltpu

# Set to jnp.bfloat16 for ~2x MXU throughput on v5e/v6e/v7x (bf16-native MXU,
# f32 accumulation kept via preferred_element_type).  Left at f32 here so the
# 1e-4 check against the f32 lax reference below holds.
_MXU_DTYPE = jnp.float32


def _shift_flat(x2d, s, hw):
    """result[:, p] = x2d[:, p + s], zero-filled outside [0, hw)."""
    if s == 0:
        return x2d
    c = x2d.shape[0]
    zeros = jnp.zeros((c, abs(s)), x2d.dtype)
    if s > 0:
        return jnp.concatenate([x2d[:, s:], zeros], axis=1)
    return jnp.concatenate([zeros, x2d[:, :hw + s]], axis=1)


def _im2col(x2d, H, W, col_masks):
    """(C, H*W) -> (9*C, H*W) patch matrix for a 3x3 / pad=1 / stride=1 conv.

    Row index is k*C + c with k = ky*3 + kx (matches HWIO weight reshape).
    Out-of-image taps are zero: row overflow is handled by the zero fill of
    the shift, column overflow by the precomputed column masks.
    """
    hw = H * W
    taps = []
    for dy in (-1, 0, 1):
        for dx in (-1, 0, 1):
            t = _shift_flat(x2d, dy * W + dx, hw)
            if dx != 0:
                t = jnp.where(col_masks[dx], t, 0.0)
            taps.append(t)
    return jnp.concatenate(taps, axis=0)


def _basic_block_kernel(x_ref, w1_ref, s1_ref, b1_ref,
                        w2_ref, s2_ref, b2_ref, o_ref, *, H, W):
    """One batch element: conv3x3+bn1+relu -> conv3x3+bn2 + residual -> relu.

    x_ref:  (1, Cin, H*W)        NCHW input, spatial flattened onto lanes
    w*_ref: (Cout, 9*Cin)        im2col weight matrix
    s*/b*:  (Cout, 1)            folded BatchNorm scale / bias
    o_ref:  (1, Cout, H*W)
    """
    hw = H * W
    x = x_ref[0].astype(jnp.float32)                       # (Cin, H*W)

    # Column-validity masks for dx = -1 / +1, shared by both convs.
    col = jax.lax.broadcasted_iota(jnp.int32, (1, hw), 1) % W
    col_masks = {-1: col >= 1, 1: col <= W - 2}

    # conv1 -> bn1 -> relu : one MXU matmul, f32 accumulation.
    patch1 = _im2col(x.astype(_MXU_DTYPE), H, W, col_masks)
    y1 = jnp.dot(w1_ref[...].astype(_MXU_DTYPE), patch1,
                 preferred_element_type=jnp.float32)
    y1 = y1 * s1_ref[...] + b1_ref[...]
    h = jnp.maximum(y1, 0.0)                                # stays in VMEM

    # conv2 -> bn2 -> + residual -> relu : residual re-used from VMEM.
    patch2 = _im2col(h.astype(_MXU_DTYPE), H, W, col_masks)
    y2 = jnp.dot(w2_ref[...].astype(_MXU_DTYPE), patch2,
                 preferred_element_type=jnp.float32)
    y2 = y2 * s2_ref[...] + b2_ref[...] + x
    o_ref[0] = jnp.maximum(y2, 0.0).astype(o_ref.dtype)


def fold_bn(gamma, beta, mean, var, eps=1e-5):
    scale = gamma / jnp.sqrt(var + eps)
    bias = beta - mean * scale
    return scale, bias


def basic_block_forward(x_nchw, params):
    """BasicBlock.forward with stride=1, downsample=None, is_last=False."""
    N, C, H, W = x_nchw.shape
    hw = H * W
    cout1 = params["w1"].shape[-1]
    cout2 = params["w2"].shape[-1]
    assert cout2 == C, "residual path requires Cout == Cin (downsample=None)"

    # Contiguous view only -- no HBM transpose / pad passes.
    x_flat = x_nchw.reshape(N, C, hw)

    s1, b1 = fold_bn(params["bn1_gamma"], params["bn1_beta"],
                     params["bn1_mean"], params["bn1_var"])
    s2, b2 = fold_bn(params["bn2_gamma"], params["bn2_beta"],
                     params["bn2_mean"], params["bn2_var"])

    # HWIO (3,3,Cin,Cout) -> (Cout, 9*Cin); row order k*Cin+cin, k = ky*3+kx,
    # matching the tap order produced by _im2col.
    w1m = params["w1"].reshape(9 * C, cout1).T
    w2m = params["w2"].reshape(9 * cout1, cout2).T
    s1c = s1.reshape(cout1, 1).astype(jnp.float32)
    b1c = b1.reshape(cout1, 1).astype(jnp.float32)
    s2c = s2.reshape(cout2, 1).astype(jnp.float32)
    b2c = b2.reshape(cout2, 1).astype(jnp.float32)

    kernel = functools.partial(_basic_block_kernel, H=H, W=W)

    out_flat = pl.pallas_call(
        kernel,
        out_shape=jax.ShapeDtypeStruct((N, cout2, hw), x_nchw.dtype),
        grid_spec=pltpu.PrefetchScalarGridSpec(
            num_scalar_prefetch=0,
            grid=(N,),
            in_specs=[
                pl.BlockSpec((1, C, hw), lambda n: (n, 0, 0)),
                pl.BlockSpec((cout1, 9 * C), lambda n: (0, 0)),
                pl.BlockSpec((cout1, 1), lambda n: (0, 0)),
                pl.BlockSpec((cout1, 1), lambda n: (0, 0)),
                pl.BlockSpec((cout2, 9 * cout1), lambda n: (0, 0)),
                pl.BlockSpec((cout2, 1), lambda n: (0, 0)),
                pl.BlockSpec((cout2, 1), lambda n: (0, 0)),
            ],
            out_specs=pl.BlockSpec((1, cout2, hw), lambda n: (n, 0, 0)),
        ),
        compiler_params=pltpu.CompilerParams(
            dimension_semantics=("parallel",)),   # batch steps shard across TCs
    )(x_flat, w1m, s1c, b1c, w2m, s2c, b2c)

    # TODO(synk): stride != 1, downsample path and is_last=True (preact) are
    # not exercised by the default-constructed module and are not implemented.
    # TODO(synk): for real ResNet stages (large H*W), add a row-tile grid axis
    # with a 2-row halo so per-step VMEM stays bounded on v7x (64 MiB).
    return out_flat.reshape(N, cout2, H, W)


def _reference_forward(x_nchw, params):
    """Pure-JAX reference (lax conv, NCHW) for verification."""
    def conv(x, w_hwio):
        w_oihw = jnp.transpose(w_hwio, (3, 2, 0, 1))
        return jax.lax.conv_general_dilated(
            x, w_oihw, window_strides=(1, 1), padding=((1, 1), (1, 1)),
            dimension_numbers=("NCHW", "OIHW", "NCHW"))

    def bn(x, g, b, m, v, eps=1e-5):
        g = g[None, :, None, None]
        b = b[None, :, None, None]
        m = m[None, :, None, None]
        v = v[None, :, None, None]
        return (x - m) / jnp.sqrt(v + eps) * g + b

    out = conv(x_nchw, params["w1"])
    out = bn(out, params["bn1_gamma"], params["bn1_beta"],
             params["bn1_mean"], params["bn1_var"])
    out = jnp.maximum(out, 0.0)
    out = conv(out, params["w2"])
    out = bn(out, params["bn2_gamma"], params["bn2_beta"],
             params["bn2_mean"], params["bn2_var"])
    out = out + x_nchw
    return jnp.maximum(out, 0.0)


def make_params(key, inplanes, planes):
    k = jax.random.split(key, 4)
    fan1 = inplanes * 9
    fan2 = planes * 9
    return {
        # weights stored HWIO: (3, 3, Cin, Cout)
        "w1": jax.random.normal(k[0], (3, 3, inplanes, planes),
                                jnp.float32) / jnp.sqrt(fan1),
        "w2": jax.random.normal(k[1], (3, 3, planes, planes),
                                jnp.float32) / jnp.sqrt(fan2),
        "bn1_gamma": jnp.ones((planes,), jnp.float32),
        "bn1_beta": jnp.zeros((planes,), jnp.float32),
        "bn1_mean": 0.1 * jax.random.normal(k[2], (planes,), jnp.float32),
        "bn1_var": jnp.ones((planes,), jnp.float32) * 0.9,
        "bn2_gamma": jnp.ones((planes,), jnp.float32),
        "bn2_beta": jnp.zeros((planes,), jnp.float32),
        "bn2_mean": 0.1 * jax.random.normal(k[3], (planes,), jnp.float32),
        "bn2_var": jnp.ones((planes,), jnp.float32) * 1.1,
    }


if __name__ == "__main__":
    key = jax.random.PRNGKey(0)
    kx, kp = jax.random.split(key)

    N, C, H, W = 2, 4, 16, 16          # inplanes = planes = 4, stride = 1
    x = jax.random.normal(kx, (N, C, H, W), jnp.float32)
    params = make_params(kp, C, C)

    fwd = jax.jit(basic_block_forward)
    out = jax.block_until_ready(fwd(x, params))

    ref = _reference_forward(x, params)
    assert out.shape == ref.shape == (N, C, H, W)
    assert jnp.allclose(out, ref, atol=1e-4, rtol=1e-4), (
        float(jnp.max(jnp.abs(out - ref))))

    print("KERNEL_OK")
</pallas_src>

<mosaic_0001>
module attributes {stable_mosaic.version = 11 : i64} {
  func.func @_basic_block_kernel(%arg0: i32, %arg1: memref<1x4x256xf32, #tpu.memory_space<vmem>>, %arg2: memref<4x36xf32, #tpu.memory_space<vmem>>, %arg3: memref<4x1xf32, #tpu.memory_space<vmem>>, %arg4: memref<4x1xf32, #tpu.memory_space<vmem>>, %arg5: memref<4x36xf32, #tpu.memory_space<vmem>>, %arg6: memref<4x1xf32, #tpu.memory_space<vmem>>, %arg7: memref<4x1xf32, #tpu.memory_space<vmem>>, %arg8: memref<1x4x256xf32, #tpu.memory_space<vmem>>) attributes {dimension_semantics = [#tpu.dimension_semantics<parallel>], iteration_bounds = array<i64: 2>, scalar_prefetch = 0 : i64, scratch_operands = 0 : i64, tpu.core_type = #tpu.core_type<tc>, window_params = [{transform_indices = @transform_0, window_bounds = array<i64: 1, 4, 256>}, {pipeline_mode = #tpu.pipeline_mode<synchronous>, transform_indices = @transform_1, window_bounds = array<i64: 4, 36>}, {pipeline_mode = #tpu.pipeline_mode<synchronous>, transform_indices = @transform_2, window_bounds = array<i64: 4, 1>}, {pipeline_mode = #tpu.pipeline_mode<synchronous>, transform_indices = @transform_3, window_bounds = array<i64: 4, 1>}, {pipeline_mode = #tpu.pipeline_mode<synchronous>, transform_indices = @transform_4, window_bounds = array<i64: 4, 36>}, {pipeline_mode = #tpu.pipeline_mode<synchronous>, transform_indices = @transform_5, window_bounds = array<i64: 4, 1>}, {pipeline_mode = #tpu.pipeline_mode<synchronous>, transform_indices = @transform_6, window_bounds = array<i64: 4, 1>}, {transform_indices = @transform_7, window_bounds = array<i64: 1, 4, 256>}]} {
    %c0 = arith.constant 0 : index
    %c0_0 = arith.constant 0 : index
    %c0_1 = arith.constant 0 : index
    %0 = vector.load %arg1[%c0, %c0_0, %c0_1] : memref<1x4x256xf32, #tpu.memory_space<vmem>>, vector<1x4x256xf32>
    %1 = vector.shape_cast %0 : vector<1x4x256xf32> to vector<4x256xf32>
    %2 = tpu.iota {dimensions = array<i32: 1>} : vector<1x256xi32>
    %c16_i32 = arith.constant 16 : i32
    %c0_i32 = arith.constant 0 : i32
    %3 = arith.cmpi eq, %c16_i32, %c0_i32 : i32
    %c1_i32 = arith.constant 1 : i32
    %4 = arith.select %3, %c1_i32, %c16_i32 : i32
    %5 = vector.broadcast %4 : i32 to vector<1x256xi32>
    %6 = arith.remsi %2, %5 : vector<1x256xi32>
    %c0_i32_2 = arith.constant 0 : i32
    %7 = vector.broadcast %c0_i32_2 : i32 to vector<1x256xi32>
    %8 = arith.cmpi ne, %6, %7 : vector<1x256xi32>
    %c0_i32_3 = arith.constant 0 : i32
    %9 = vector.broadcast %c0_i32_3 : i32 to vector<1x256xi32>
    %10 = arith.cmpi slt, %6, %9 : vector<1x256xi32>
    %c0_i32_4 = arith.constant 0 : i32
    %11 = arith.cmpi slt, %4, %c0_i32_4 : i32
    %12 = vector.broadcast %11 : i1 to vector<1x256xi1>
    %13 = vector.broadcast %12 : vector<1x256xi1> to vector<1x256xi1>
    %14 = arith.xori %10, %13 : vector<1x256xi1>
    %15 = arith.andi %14, %8 : vector<1x256xi1>
    %16 = vector.broadcast %4 : i32 to vector<1x256xi32>
    %17 = arith.addi %6, %16 : vector<1x256xi32>
    %18 = arith.select %15, %17, %6 : vector<1x256xi1>, vector<1x256xi32>
    %c1_i32_5 = arith.constant 1 : i32
    %19 = vector.broadcast %c1_i32_5 : i32 to vector<1x256xi32>
    %20 = arith.cmpi sge, %18, %19 : vector<1x256xi32>
    %c14_i32 = arith.constant 14 : i32
    %21 = vector.broadcast %c14_i32 : i32 to vector<1x256xi32>
    %22 = arith.cmpi sle, %18, %21 : vector<1x256xi32>
    %cst = arith.constant 0.000000e+00 : f32
    %23 = vector.broadcast %cst : f32 to vector<4x17xf32>
    %24 = vector.extract_strided_slice %1 {offsets = [0, 0], sizes = [4, 239], strides = [1, 1]} : vector<4x256xf32> to vector<4x239xf32>
    %25 = tpu.concatenate %23, %24 in 1 : vector<4x17xf32>, vector<4x239xf32> -> vector<4x256xf32>
    %cst_6 = arith.constant 0.000000e+00 : f32
    %26 = vector.shape_cast %20 : vector<1x256xi1> to vector<1x256xi1>
    %27 = vector.broadcast %26 : vector<1x256xi1> to vector<4x256xi1>
    %28 = vector.broadcast %cst_6 : f32 to vector<4x256xf32>
    %29 = arith.select %27, %25, %28 : vector<4x256xi1>, vector<4x256xf32>
    %cst_7 = arith.constant 0.000000e+00 : f32
    %30 = vector.broadcast %cst_7 : f32 to vector<4x16xf32>
    %31 = vector.extract_strided_slice %1 {offsets = [0, 0], sizes = [4, 240], strides = [1, 1]} : vector<4x256xf32> to vector<4x240xf32>
    %32 = tpu.concatenate %30, %31 in 1 : vector<4x16xf32>, vector<4x240xf32> -> vector<4x256xf32>
    %cst_8 = arith.constant 0.000000e+00 : f32
    %33 = vector.broadcast %cst_8 : f32 to vector<4x15xf32>
    %34 = vector.extract_strided_slice %1 {offsets = [0, 0], sizes = [4, 241], strides = [1, 1]} : vector<4x256xf32> to vector<4x241xf32>
    %35 = tpu.concatenate %33, %34 in 1 : vector<4x15xf32>, vector<4x241xf32> -> vector<4x256xf32>
    %cst_9 = arith.constant 0.000000e+00 : f32
    %36 = vector.shape_cast %22 : vector<1x256xi1> to vector<1x256xi1>
    %37 = vector.broadcast %36 : vector<1x256xi1> to vector<4x256xi1>
    %38 = vector.broadcast %cst_9 : f32 to vector<4x256xf32>
    %39 = arith.select %37, %35, %38 : vector<4x256xi1>, vector<4x256xf32>
    %cst_10 = arith.constant 0.000000e+00 : f32
    %40 = vector.broadcast %cst_10 : f32 to vector<4x1xf32>
    %41 = vector.extract_strided_slice %1 {offsets = [0, 0], sizes = [4, 255], strides = [1, 1]} : vector<4x256xf32> to vector<4x255xf32>
    %42 = tpu.concatenate %40, %41 in 1 : vector<4x1xf32>, vector<4x255xf32> -> vector<4x256xf32>
    %cst_11 = arith.constant 0.000000e+00 : f32
    %43 = vector.shape_cast %20 : vector<1x256xi1> to vector<1x256xi1>
    %44 = vector.broadcast %43 : vector<1x256xi1> to vector<4x256xi1>
    %45 = vector.broadcast %cst_11 : f32 to vector<4x256xf32>
    %46 = arith.select %44, %42, %45 : vector<4x256xi1>, vector<4x256xf32>
    %cst_12 = arith.constant 0.000000e+00 : f32
    %47 = vector.broadcast %cst_12 : f32 to vector<4x1xf32>
    %48 = vector.extract_strided_slice %1 {offsets = [0, 1], sizes = [4, 255], strides = [1, 1]} : vector<4x256xf32> to vector<4x255xf32>
    %49 = tpu.concatenate %48, %47 in 1 : vector<4x255xf32>, vector<4x1xf32> -> vector<4x256xf32>
    %cst_13 = arith.constant 0.000000e+00 : f32
    %50 = vector.shape_cast %22 : vector<1x256xi1> to vector<1x256xi1>
    %51 = vector.broadcast %50 : vector<1x256xi1> to vector<4x256xi1>
    %52 = vector.broadcast %cst_13 : f32 to vector<4x256xf32>
    %53 = arith.select %51, %49, %52 : vector<4x256xi1>, vector<4x256xf32>
    %cst_14 = arith.constant 0.000000e+00 : f32
    %54 = vector.broadcast %cst_14 : f32 to vector<4x15xf32>
    %55 = vector.extract_strided_slice %1 {offsets = [0, 15], sizes = [4, 241], strides = [1, 1]} : vector<4x256xf32> to vector<4x241xf32>
    %56 = tpu.concatenate %55, %54 in 1 : vector<4x241xf32>, vector<4x15xf32> -> vector<4x256xf32>
    %cst_15 = arith.constant 0.000000e+00 : f32
    %57 = vector.shape_cast %20 : vector<1x256xi1> to vector<1x256xi1>
    %58 = vector.broadcast %57 : vector<1x256xi1> to vector<4x256xi1>
    %59 = vector.broadcast %cst_15 : f32 to vector<4x256xf32>
    %60 = arith.select %58, %56, %59 : vector<4x256xi1>, vector<4x256xf32>
    %cst_16 = arith.constant 0.000000e+00 : f32
    %61 = vector.broadcast %cst_16 : f32 to vector<4x16xf32>
    %62 = vector.extract_strided_slice %1 {offsets = [0, 16], sizes = [4, 240], strides = [1, 1]} : vector<4x256xf32> to vector<4x240xf32>
    %63 = tpu.concatenate %62, %61 in 1 : vector<4x240xf32>, vector<4x16xf32> -> vector<4x256xf32>
    %cst_17 = arith.constant 0.000000e+00 : f32
    %64 = vector.broadcast %cst_17 : f32 to vector<4x17xf32>
    %65 = vector.extract_strided_slice %1 {offsets = [0, 17], sizes = [4, 239], strides = [1, 1]} : vector<4x256xf32> to vector<4x239xf32>
    %66 = tpu.concatenate %65, %64 in 1 : vector<4x239xf32>, vector<4x17xf32> -> vector<4x256xf32>
    %cst_18 = arith.constant 0.000000e+00 : f32
    %67 = vector.shape_cast %22 : vector<1x256xi1> to vector<1x256xi1>
    %68 = vector.broadcast %67 : vector<1x256xi1> to vector<4x256xi1>
    %69 = vector.broadcast %cst_18 : f32 to vector<4x256xf32>
    %70 = arith.select %68, %66, %69 : vector<4x256xi1>, vector<4x256xf32>
    %71 = tpu.concatenate %29, %32, %39, %46, %1, %53, %60, %63, %70 in 0 : vector<4x256xf32>, vector<4x256xf32>, vector<4x256xf32>, vector<4x256xf32>, vector<4x256xf32>, vector<4x256xf32>, vector<4x256xf32>, vector<4x256xf32>, vector<4x256xf32> -> vector<36x256xf32>
    %c0_19 = arith.constant 0 : index
    %c0_20 = arith.constant 0 : index
    %72 = vector.load %arg2[%c0_19, %c0_20] : memref<4x36xf32, #tpu.memory_space<vmem>>, vector<4x36xf32>
    %cst_21 = arith.constant dense<0.000000e+00> : vector<4x256xf32>
    %73 = tpu.matmul %72, %71, %cst_21 {dimension_numbers = #tpu.dot_dimension_numbers<[1], [0], [0], [1], [0, 0, 1, 1], [], []>} : vector<4x36xf32>, vector<36x256xf32>, vector<4x256xf32> -> vector<4x256xf32>
    %c0_22 = arith.constant 0 : index
    %c0_23 = arith.constant 0 : index
    %74 = vector.load %arg3[%c0_22, %c0_23] : memref<4x1xf32, #tpu.memory_space<vmem>>, vector<4x1xf32>
    %75 = vector.broadcast %74 : vector<4x1xf32> to vector<4x256xf32>
    %76 = arith.mulf %73, %75 : vector<4x256xf32>
    %c0_24 = arith.constant 0 : index
    %c0_25 = arith.constant 0 : index
    %77 = vector.load %arg4[%c0_24, %c0_25] : memref<4x1xf32, #tpu.memory_space<vmem>>, vector<4x1xf32>
    %78 = vector.broadcast %77 : vector<4x1xf32> to vector<4x256xf32>
    %79 = arith.addf %76, %78 : vector<4x256xf32>
    %cst_26 = arith.constant 0.000000e+00 : f32
    %80 = vector.broadcast %cst_26 : f32 to vector<4x256xf32>
    %81 = arith.maximumf %79, %80 : vector<4x256xf32>
    %cst_27 = arith.constant 0.000000e+00 : f32
    %82 = vector.broadcast %cst_27 : f32 to vector<4x17xf32>
    %83 = vector.extract_strided_slice %81 {offsets = [0, 0], sizes = [4, 239], strides = [1, 1]} : vector<4x256xf32> to vector<4x239xf32>
    %84 = tpu.concatenate %82, %83 in 1 : vector<4x17xf32>, vector<4x239xf32> -> vector<4x256xf32>
    %cst_28 = arith.constant 0.000000e+00 : f32
    %85 = vector.shape_cast %20 : vector<1x256xi1> to vector<1x256xi1>
    %86 = vector.broadcast %85 : vector<1x256xi1> to vector<4x256xi1>
    %87 = vector.broadcast %cst_28 : f32 to vector<4x256xf32>
    %88 = arith.select %86, %84, %87 : vector<4x256xi1>, vector<4x256xf32>
    %cst_29 = arith.constant 0.000000e+00 : f32
    %89 = vector.broadcast %cst_29 : f32 to vector<4x16xf32>
    %90 = vector.extract_strided_slice %81 {offsets = [0, 0], sizes = [4, 240], strides = [1, 1]} : vector<4x256xf32> to vector<4x240xf32>
    %91 = tpu.concatenate %89, %90 in 1 : vector<4x16xf32>, vector<4x240xf32> -> vector<4x256xf32>
    %cst_30 = arith.constant 0.000000e+00 : f32
    %92 = vector.broadcast %cst_30 : f32 to vector<4x15xf32>
    %93 = vector.extract_strided_slice %81 {offsets = [0, 0], sizes = [4, 241], strides = [1, 1]} : vector<4x256xf32> to vector<4x241xf32>
    %94 = tpu.concatenate %92, %93 in 1 : vector<4x15xf32>, vector<4x241xf32> -> vector<4x256xf32>
    %cst_31 = arith.constant 0.000000e+00 : f32
    %95 = vector.shape_cast %22 : vector<1x256xi1> to vector<1x256xi1>
    %96 = vector.broadcast %95 : vector<1x256xi1> to vector<4x256xi1>
    %97 = vector.broadcast %cst_31 : f32 to vector<4x256xf32>
    %98 = arith.select %96, %94, %97 : vector<4x256xi1>, vector<4x256xf32>
    %cst_32 = arith.constant 0.000000e+00 : f32
    %99 = vector.broadcast %cst_32 : f32 to vector<4x1xf32>
    %100 = vector.extract_strided_slice %81 {offsets = [0, 0], sizes = [4, 255], strides = [1, 1]} : vector<4x256xf32> to vector<4x255xf32>
    %101 = tpu.concatenate %99, %100 in 1 : vector<4x1xf32>, vector<4x255xf32> -> vector<4x256xf32>
    %cst_33 = arith.constant 0.000000e+00 : f32
    %102 = vector.shape_cast %20 : vector<1x256xi1> to vector<1x256xi1>
    %103 = vector.broadcast %102 : vector<1x256xi1> to vector<4x256xi1>
    %104 = vector.broadcast %cst_33 : f32 to vector<4x256xf32>
    %105 = arith.select %103, %101, %104 : vector<4x256xi1>, vector<4x256xf32>
    %cst_34 = arith.constant 0.000000e+00 : f32
    %106 = vector.broadcast %cst_34 : f32 to vector<4x1xf32>
    %107 = vector.extract_strided_slice %81 {offsets = [0, 1], sizes = [4, 255], strides = [1, 1]} : vector<4x256xf32> to vector<4x255xf32>
    %108 = tpu.concatenate %107, %106 in 1 : vector<4x255xf32>, vector<4x1xf32> -> vector<4x256xf32>
    %cst_35 = arith.constant 0.000000e+00 : f32
    %109 = vector.shape_cast %22 : vector<1x256xi1> to vector<1x256xi1>
    %110 = vector.broadcast %109 : vector<1x256xi1> to vector<4x256xi1>
    %111 = vector.broadcast %cst_35 : f32 to vector<4x256xf32>
    %112 = arith.select %110, %108, %111 : vector<4x256xi1>, vector<4x256xf32>
    %cst_36 = arith.constant 0.000000e+00 : f32
    %113 = vector.broadcast %cst_36 : f32 to vector<4x15xf32>
    %114 = vector.extract_strided_slice %81 {offsets = [0, 15], sizes = [4, 241], strides = [1, 1]} : vector<4x256xf32> to vector<4x241xf32>
    %115 = tpu.concatenate %114, %113 in 1 : vector<4x241xf32>, vector<4x15xf32> -> vector<4x256xf32>
    %cst_37 = arith.constant 0.000000e+00 : f32
    %116 = vector.shape_cast %20 : vector<1x256xi1> to vector<1x256xi1>
    %117 = vector.broadcast %116 : vector<1x256xi1> to vector<4x256xi1>
    %118 = vector.broadcast %cst_37 : f32 to vector<4x256xf32>
    %119 = arith.select %117, %115, %118 : vector<4x256xi1>, vector<4x256xf32>
    %cst_38 = arith.constant 0.000000e+00 : f32
    %120 = vector.broadcast %cst_38 : f32 to vector<4x16xf32>
    %121 = vector.extract_strided_slice %81 {offsets = [0, 16], sizes = [4, 240], strides = [1, 1]} : vector<4x256xf32> to vector<4x240xf32>
    %122 = tpu.concatenate %121, %120 in 1 : vector<4x240xf32>, vector<4x16xf32> -> vector<4x256xf32>
    %cst_39 = arith.constant 0.000000e+00 : f32
    %123 = vector.broadcast %cst_39 : f32 to vector<4x17xf32>
    %124 = vector.extract_strided_slice %81 {offsets = [0, 17], sizes = [4, 239], strides = [1, 1]} : vector<4x256xf32> to vector<4x239xf32>
    %125 = tpu.concatenate %124, %123 in 1 : vector<4x239xf32>, vector<4x17xf32> -> vector<4x256xf32>
    %cst_40 = arith.constant 0.000000e+00 : f32
    %126 = vector.shape_cast %22 : vector<1x256xi1> to vector<1x256xi1>
    %127 = vector.broadcast %126 : vector<1x256xi1> to vector<4x256xi1>
    %128 = vector.broadcast %cst_40 : f32 to vector<4x256xf32>
    %129 = arith.select %127, %125, %128 : vector<4x256xi1>, vector<4x256xf32>
    %130 = tpu.concatenate %88, %91, %98, %105, %81, %112, %119, %122, %129 in 0 : vector<4x256xf32>, vector<4x256xf32>, vector<4x256xf32>, vector<4x256xf32>, vector<4x256xf32>, vector<4x256xf32>, vector<4x256xf32>, vector<4x256xf32>, vector<4x256xf32> -> vector<36x256xf32>
    %c0_41 = arith.constant 0 : index
    %c0_42 = arith.constant 0 : index
    %131 = vector.load %arg5[%c0_41, %c0_42] : memref<4x36xf32, #tpu.memory_space<vmem>>, vector<4x36xf32>
    %cst_43 = arith.constant dense<0.000000e+00> : vector<4x256xf32>
    %132 = tpu.matmul %131, %130, %cst_43 {dimension_numbers = #tpu.dot_dimension_numbers<[1], [0], [0], [1], [0, 0, 1, 1], [], []>} : vector<4x36xf32>, vector<36x256xf32>, vector<4x256xf32> -> vector<4x256xf32>
    %c0_44 = arith.constant 0 : index
    %c0_45 = arith.constant 0 : index
    %133 = vector.load %arg6[%c0_44, %c0_45] : memref<4x1xf32, #tpu.memory_space<vmem>>, vector<4x1xf32>
    %134 = vector.broadcast %133 : vector<4x1xf32> to vector<4x256xf32>
    %135 = arith.mulf %132, %134 : vector<4x256xf32>
    %c0_46 = arith.constant 0 : index
    %c0_47 = arith.constant 0 : index
    %136 = vector.load %arg7[%c0_46, %c0_47] : memref<4x1xf32, #tpu.memory_space<vmem>>, vector<4x1xf32>
    %137 = vector.broadcast %136 : vector<4x1xf32> to vector<4x256xf32>
    %138 = arith.addf %135, %137 : vector<4x256xf32>
    %139 = arith.addf %138, %1 : vector<4x256xf32>
    %cst_48 = arith.constant 0.000000e+00 : f32
    %140 = vector.broadcast %cst_48 : f32 to vector<4x256xf32>
    %141 = arith.maximumf %139, %140 : vector<4x256xf32>
    %c0_49 = arith.constant 0 : index
    %c0_50 = arith.constant 0 : index
    %c0_51 = arith.constant 0 : index
    %142 = vector.load %arg8[%c0_49, %c0_50, %c0_51] : memref<1x4x256xf32, #tpu.memory_space<vmem>>, vector<1x4x256xf32>
    %143 = vector.shape_cast %142 : vector<1x4x256xf32> to vector<4x256xf32>
    %144 = vector.shape_cast %141 : vector<4x256xf32> to vector<1x4x256xf32>
    tpu.vector_store %arg8[%c0_49, %c0_50, %c0_51], %144 {strides = array<i32>} : memref<1x4x256xf32, #tpu.memory_space<vmem>>, vector<1x4x256xf32>,
    return
  }
  func.func @transform_0(%arg0: i32) -> (i32, i32, i32) {
    %c0_i32 = arith.constant 0 : i32
    %c0_i32_0 = arith.constant 0 : i32
    %c0_i32_1 = arith.constant 0 : i32
    return %arg0, %c0_i32, %c0_i32_0 : i32, i32, i32
  }
  func.func @transform_1(%arg0: i32) -> (i32, i32) {
    %c0_i32 = arith.constant 0 : i32
    %c0_i32_0 = arith.constant 0 : i32
    %c0_i32_1 = arith.constant 0 : i32
    return %c0_i32, %c0_i32_0 : i32, i32
  }
  func.func @transform_2(%arg0: i32) -> (i32, i32) {
    %c0_i32 = arith.constant 0 : i32
    %c0_i32_0 = arith.constant 0 : i32
    %c0_i32_1 = arith.constant 0 : i32
    return %c0_i32, %c0_i32_0 : i32, i32
  }
  func.func @transform_3(%arg0: i32) -> (i32, i32) {
    %c0_i32 = arith.constant 0 : i32
    %c0_i32_0 = arith.constant 0 : i32
    %c0_i32_1 = arith.constant 0 : i32
    return %c0_i32, %c0_i32_0 : i32, i32
  }
  func.func @transform_4(%arg0: i32) -> (i32, i32) {
    %c0_i32 = arith.constant 0 : i32
    %c0_i32_0 = arith.constant 0 : i32
    %c0_i32_1 = arith.constant 0 : i32
    return %c0_i32, %c0_i32_0 : i32, i32
  }
  func.func @transform_5(%arg0: i32) -> (i32, i32) {
    %c0_i32 = arith.constant 0 : i32
    %c0_i32_0 = arith.constant 0 : i32
    %c0_i32_1 = arith.constant 0 : i32
    return %c0_i32, %c0_i32_0 : i32, i32
  }
  func.func @transform_6(%arg0: i32) -> (i32, i32) {
    %c0_i32 = arith.constant 0 : i32
    %c0_i32_0 = arith.constant 0 : i32
    %c0_i32_1 = arith.constant 0 : i32
    return %c0_i32, %c0_i32_0 : i32, i32
  }
  func.func @transform_7(%arg0: i32) -> (i32, i32, i32) {
    %c0_i32 = arith.constant 0 : i32
    %c0_i32_0 = arith.constant 0 : i32
    %c0_i32_1 = arith.constant 0 : i32
    return %arg0, %c0_i32, %c0_i32_0 : i32, i32, i32
  }
}

</mosaic_0001>

<bundles_post_ra>
// kernel: basic_block_forward.1
= control target key start
LH: loop header
LB: loop body
LE: loop exit
PB: predicated region body
PF: predicated region fallthrough
CT: control target
= control target key end

     0   :  { %s986_s24 = smov 0   ;;  %s1192_s0 = inlined_call_operand.vmem [shape: f32[2,4,256], index: 0, kind: input, shape index: {}]   ;;  %s1193_s1 = inlined_call_operand.vmem [shape: f32[4,36], index: 1, kind: input, shape index: {}]   ;;  %s1194_s2 = inlined_call_operand.vmem [shape: f32[4,1], index: 2, kind: input, shape index: {}]   ;;  %s1195_s3 = inlined_call_operand.vmem [shape: f32[4,1], index: 3, kind: input, shape index: {}]   ;;  %s1196_s4 = inlined_call_operand.vmem [shape: f32[4,36], index: 4, kind: input, shape index: {}]   ;;  %s1197_s5 = inlined_call_operand.vmem [shape: f32[4,1], index: 5, kind: input, shape index: {}]   ;;  %s1198_s6 = inlined_call_operand.vmem [shape: f32[4,1], index: 6, kind: input, shape index: {}]   ;;  %s1199_s7 = inlined_call_operand.vmem [shape: f32[2,4,256], index: 7, kind: output, shape index: {}]  }
   0x1 LB: > { %s802_s25 = sadd.s32 4294967295, %s934_s24   ;;  %p806_p0 = scmp.ge.s32.totalorder %s934_s24, 1  ;;  %s934_s24 = sphi %s986_s24, %s17_s24  }
   0x2   : > { %p237_p1 = scmp.lt.s32.totalorder %s934_s24, 3 }
   0x4   : > { %p238_p2 = pnand %p806_p0, %p237_p1 }
   0x5   : > { %p269_p3 = scmp.lt.s32.totalorder (!%p238_p2), %s802_s25, 1  ;;  %s936_s30 = smov (!%p238_p2), 17   ;;  %v944_v4 = vmov (!%p238_p2), 0.0   ;;  %v517_v5 = vld [vmem:[%s1194_s2] sm:$0xf] (!%p238_p2)  ;;  %v945_v6 = vmov (!%p238_p2), 0   ;;  %v280_v8 = vlaneseq (!%p238_p2) }
   0x6   : > { %241 = sbr.rel (%p238_p2) target bundleno = 747 (0x2eb), region = 48  ;;  %s937_s8 = smov (!%p238_p2), 1   ;;  %510 = vmatprep.mubr.f32.mxu0 (!%p238_p2), %v944_v4  ;;  %715 = vmatprep.mubr.f32.mxu1 (!%p238_p2), %v944_v4  ;;  %v525_v7 = vld [vmem:[%s1195_s3] sm:$0xf] (!%p238_p2)  ;;  %vm317_vm0 = vcmask (!%p238_p2), 138240   ;;  %vm355_vm2 = vcmask (!%p238_p2), 7168  }
   0x7   : > { %s938_s9 = smov (!%p238_p2), 15   ;;  %s939_s10 = smov (!%p238_p2), 16   ;;  %890 = vset.pattern.permute.xlu1 (!%p238_p2), %v945_v6  ;;  %891 = vset.pattern.permute.xlu0 (!%p238_p2), %v945_v6  ;;  %v281_v9 = vand.u32 (!%p238_p2), 127, %v280_v8  ;;  %vm340_vm4 = vcmask (!%p238_p2), 121856   ;;  %vm332_vm5 = vcmask (!%p238_p2), 130048   ;;  %vm366_vm7 = vcmask (!%p238_p2), 1039360  }
   0x8   : > { %s940_s11 = smov (!%p238_p2), 127   ;;  %s941_s12 = smov (!%p238_p2), 112   ;;  %vm426_vm8 = vcmask (!%p238_p2), 1043456   ;;  %vm388_vm10 = vcmask (!%p238_p2), 916480   ;;  %vm377_vm11 = vcmask (!%p238_p2), 924672   ;;  %vm396_vm12 = vcmask (!%p238_p2), 908288  }
   0x9   : > { %s942_s13 = smov (!%p238_p2), 113   ;;  %s943_s14 = smov (!%p238_p2), 111   ;;  %v282_v10 = vadd.s32 (!%p238_p2), 128, %v281_v9  ;;  %v287_v11 = vand.u32 (!%p238_p2), 15, %v281_v9  ;;  %vm436_vm13 = vcmask (!%p238_p2), 293888  }
   0xb   : > { %v294_v12 = vand.u32 (!%p238_p2), 15, %v282_v10  ;;  %vm1029_vm1 = vcmp.ge.s32.totalorder (!%p238_p2), %v287_v11, 1  ;;  %vm1037_vm6 = vcmp.le.s32.totalorder (!%p238_p2), %v287_v11, 14 }
   0xd   : > { %s1209_s25 = smov (!%p269_p3, %s802_s25), 1  ;;  %vm1033_vm3 = vcmp.ge.s32.totalorder %v294_v12, 1  ;;  %vm1046_vm9 = vcmp.le.s32.totalorder %v294_v12, 14 }
   0xe   : > { %s819_s26 = sshll.u32 %s1209_s25, 3 }
   0xf   : > { %s273_s29 = scalar_lea.vmem %s1192_s0, %s819_s26 }
  0x10   : > { %v1002_v0 = vld [vmem:[%s273_s29] sm:$0xff] }
  0x11   : > { %v1006_v1 = vcombine.high %v1002_v0, %v1002_v0 }
  0x13   : > { %v865_v2 = vpack.i.bf16 %v1006_v1, %v1002_v0  ;;  %v875_v3 = vpack.i.bf16 %v1002_v0, %v1006_v1 }
  0x15   : > { %866 = vrot.lane.b32.xlu1 %v865_v2, %s936_s30  ;;  %856 = vrot.lane.b32.xlu0 %v865_v2, %s937_s8 }
  0x19   : > { %871 = vrot.lane.b32.xlu1 %v865_v2, %s938_s9  ;;  %861 = vrot.lane.b32.xlu0 %v865_v2, %s939_s10 }
  0x1d   : > { %876 = vrot.lane.b32.xlu0 %v875_v3, %s940_s11  ;;  %881 = vrot.lane.b32.xlu1 %v875_v3, %s941_s12 }
  0x21   : > { %886 = vrot.lane.b32.xlu0 %v875_v3, %s942_s13  ;;  %394 = vrot.lane.b32.xlu1 %v1006_v1, %s943_s14 }
  0x25   : > { %392 = vrot.lane.b32.xlu0 %v1002_v0, %s943_s14  ;;  %520 = vperm.xlu1 %890, %v517_v5  }
  0x29   : > { %528 = vperm.xlu0 %891, %v525_v7  }
  0x87   : > { %v867_v13 = vpop.permute.xlu1 %866  ;;  %v857_v15 = vpop.permute.xlu0 %856 }
  0x88   : > { %v869_v17 = vunpack.i.h.bf16 %v867_v13  ;;  %v868_v18 = vunpack.i.l.bf16 %v867_v13  ;;  %v859_v19 = vunpack.i.h.bf16 %v857_v15  ;;  %v858_v20 = vunpack.i.l.bf16 %v857_v15 }
  0x8a   : > { %v356_v22 = vsel %vm355_vm2, %v858_v20, %v859_v19  ;;  %v359_v23 = vsel %vm355_vm2, 0.0, %v858_v20  ;;  %v318_v24 = vsel %vm317_vm0, %v868_v18, %v869_v17  ;;  %v321_v33 = vsel %vm317_vm0, 0.0, %v868_v18 }
  0x8b   : > { %v360_v25 = vsel %vm1029_vm1, %v359_v23, 0.0  ;;  %v872_v26 = vpop.permute.xlu1 %871  ;;  %v862_v27 = vpop.permute.xlu0 %861  ;;  %v361_v29 = vsel %vm1033_vm3, %v356_v22, 0.0  ;;  %v327_v35 = vsel %vm1033_vm3, %v318_v24, 0.0  ;;  %v326_v53 = vsel %vm1029_vm1, %v321_v33, 0.0 }
  0x8c   : > { %v874_v30 = vunpack.i.h.bf16 %v872_v26  ;;  %v873_v31 = vunpack.i.l.bf16 %v872_v26  ;;  %v864_v32 = vunpack.i.h.bf16 %v862_v27  ;;  %v863_v34 = vunpack.i.l.bf16 %v862_v27 }
  0x8d   : > { %v410_v36 = vrot.slane %v360_v25, 4  ;;  %v411_v39 = vrot.slane %v361_v29, 4 }
  0x8e   : > { %v344_v37 = vsel %vm340_vm4, 0.0, %v873_v31  ;;  %v341_v38 = vsel %vm340_vm4, %v873_v31, %v874_v30  ;;  %v335_v40 = vsel %vm332_vm5, 0.0, %v863_v34  ;;  %v333_v43 = vsel %vm332_vm5, %v863_v34, %v864_v32  ;;  %v435_v30 = vld [vmem:[%s1193_s1] sm:$0xf] }
  0x8f   : > { %v877_v41 = vpop.permute.xlu0 %876  ;;  %v882_v42 = vpop.permute.xlu1 %881  ;;  %v350_v44 = vsel %vm1046_vm9, %v341_v38, 0.0  ;;  %v349_v45 = vsel %vm1037_vm6, %v344_v37, 0.0  ;;  %v404_v46 = vrot.slane %v335_v40, 4  ;;  %v405_v51 = vrot.slane %v333_v43, 4  ;;  %v730_v43 = vld [vmem:[%s1198_s6] sm:$0xf] }
  0x90   : > { %v879_v47 = vunpack.i.h.bf16 %v877_v41  ;;  %v878_v48 = vunpack.i.l.bf16 %v877_v41  ;;  %v884_v49 = vunpack.i.h.bf16 %v882_v42  ;;  %v883_v50 = vunpack.i.l.bf16 %v882_v42 }
  0x91   : > { %v430_v52 = vsel %vm426_vm8, %v350_v44, %v411_v39  ;;  %v427_v56 = vsel %vm426_vm8, %v326_v53, %v404_v46  ;;  %v429_v57 = vsel %vm426_vm8, %v349_v45, %v410_v36  ;;  %v428_v7 = vsel %vm426_vm8, %v327_v35, %v405_v51  ;;  %v722_v44 = vld [vmem:[%s1197_s5] sm:$0xf] }
  0x92   : > { %v367_v54 = vsel %vm366_vm7, %v879_v47, %v878_v48  ;;  %v370_v55 = vsel %vm366_vm7, %v878_v48, 0.0  ;;  %v389_v60 = vsel %vm388_vm10, %v884_v49, %v883_v50  ;;  %v391_v61 = vsel %vm388_vm10, %v883_v50, 0.0 }
  0x93   : > { %v371_v58 = vsel %vm1037_vm6, %v367_v54, 0.0  ;;  %v372_v59 = vsel %vm1046_vm9, %v370_v55, 0.0  ;;  %v887_v62 = vpop.permute.xlu0 %886  ;;  %v422_v3 = vrot.slane %v389_v60, 4  ;;  %v423_v4 = vrot.slane %v391_v61, 4  ;;  %v395_v9 = vpop.permute.xlu1 %394 }
  0x94   : > { %v417_v63 = vrot.slane %v371_v58, 4  ;;  %v418_v2 = vrot.slane %v372_v59, 4  ;;  %v889_v5 = vunpack.i.h.bf16 %v887_v62  ;;  %v888_v6 = vunpack.i.l.bf16 %v887_v62 }
  0x95   : > { %v823_v8 = vpack.c.bf16 %v429_v57, %v427_v56  ;;  %v821_v10 = vpack.c.bf16 %v430_v52, %v428_v7  ;;  %v400_v15 = vsel %vm396_vm12, %v395_v9, 0.0 }
  0x96   : > { %v378_v11 = vsel %vm377_vm11, %v889_v5, %v888_v6  ;;  %v381_v12 = vsel %vm377_vm11, %v888_v6, 0.0  ;;  %v432_v19 = vsel %vm426_vm8, %v1006_v1, %v418_v2  ;;  %v431_v22 = vsel %vm426_vm8, %v1002_v0, %v417_v63 }
  0x97   : > { %v383_v13 = vsel %vm1033_vm3, %v381_v12, 0.0  ;;  %822 = vmatprep.subr.bf16.mxu0 %v821_v10  ;;  %v393_v17 = vpop.permute.xlu0 %392  ;;  %v382_v18 = vsel %vm1029_vm1, %v378_v11, 0.0  ;;  %v402_v26 = vsel %vm1046_vm9, %v400_v15, 0.0 }
  0x98   : > { %824 = vmatpush1.bf16.msra.mxu0 %v823_v8  ;;  %v434_v20 = vsel %vm426_vm8, %v383_v13, %v423_v4  ;;  %v433_v23 = vsel %vm426_vm8, %v382_v18, %v422_v3  ;;  %v397_v27 = vsel %vm396_vm12, %v393_v17, %v395_v9 }
  0x99   : > { %v825_v24 = vpack.c.bf16 %v434_v20, %v432_v19  ;;  %v827_v25 = vpack.c.bf16 %v433_v23, %v431_v22  ;;  %v401_v29 = vsel %vm1037_vm6, %v397_v27, 0.0 }
  0x9b   : > { %826 = vmatprep.subr.bf16.mxu0 %v825_v24 }
  0x9c   : > { %828 = vmatpush1.bf16.msra.mxu0 %v827_v25 }
  0x9d   : > { %811 = vmatprep.subr.msk.mxu0 %vm426_vm8, %v402_v26 }
  0xa0   : > { %812 = vmatpush1.msk.msra.mxu0 %vm426_vm8, %v401_v29 }
  0xa1   : > { %813 = vmatmul.mubr.msk.f32.vlgmr.msra.gmra.mrb[0].mxu0 %vm436_vm13, %v435_v30 }
  0xa4   : > { %v521_v31 = vpop.permute.xlu1 %520 }
  0xa8   : > { %v529_v33 = vpop.permute.xlu0 %528 }
 0x174   : > { %v512_v32 = vpop.f32.mrb[0].mxu0 }
 0x175   : > { %v523_v34 = vmul.f32 %v521_v31, %v512_v32  ;;  %v514_v35 = vpop.f32.mrb[1].mxu0 }
 0x176   : > { %v524_v36 = vmul.f32 %v521_v31, %v514_v35 }
 0x177   : > { %v531_v37 = vadd.f32 %v529_v33, %v523_v34 }
 0x178   : > { %v532_v38 = vadd.f32 %v529_v33, %v524_v36 }
 0x179   : > { %v1101_v39 = vmax.f32 %v531_v37, 0.0 }
 0x17a   : > { %v1103_v40 = vmax.f32 %v532_v38, 0.0 }
 0x17c   : > { %v902_v41 = vpack.i.bf16 %v1103_v40, %v1101_v39  ;;  %v912_v42 = vpack.i.bf16 %v1101_v39, %v1103_v40 }
 0x17e   : > { %903 = vrot.lane.b32.xlu0 %v902_v41, %s936_s30  ;;  %893 = vrot.lane.b32.xlu1 %v902_v41, %s937_s8 }
 0x182   : > { %913 = vrot.lane.b32.xlu0 %v912_v42, %s940_s11  ;;  %898 = vrot.lane.b32.xlu1 %v902_v41, %s939_s10 }
 0x186   : > { %923 = vrot.lane.b32.xlu0 %v912_v42, %s942_s13  ;;  %908 = vrot.lane.b32.xlu1 %v902_v41, %s938_s9  ;;  %s278_s9 = scalar_lea.vmem %s1199_s7, %s819_s26 }
 0x18a   : > { %601 = vrot.lane.b32.xlu0 %v1101_v39, %s943_s14  ;;  %918 = vrot.lane.b32.xlu1 %v912_v42, %s941_s12 }
 0x18e   : > { %733 = vperm.xlu0 %891, %v730_v43   ;;  %603 = vrot.lane.b32.xlu1 %v1103_v40, %s943_s14 }
 0x192   : > { %725 = vperm.xlu1 %890, %v722_v44  }
 0x1f0   : > { %v904_v45 = vpop.permute.xlu0 %903  ;;  %v894_v46 = vpop.permute.xlu1 %893 }
 0x1f1   : > { %v896_v47 = vunpack.i.h.bf16 %v894_v46  ;;  %v895_v48 = vunpack.i.l.bf16 %v894_v46  ;;  %v906_v49 = vunpack.i.h.bf16 %v904_v45  ;;  %v905_v50 = vunpack.i.l.bf16 %v904_v45 }
 0x1f3   : > { %v571_v51 = vsel %vm355_vm2, 0.0, %v895_v48  ;;  %v568_v54 = vsel %vm355_vm2, %v895_v48, %v896_v47  ;;  %v541_v59 = vsel %vm317_vm0, %v905_v50, %v906_v49  ;;  %v544_v60 = vsel %vm317_vm0, 0.0, %v905_v50 }
 0x1f4   : > { %v914_v52 = vpop.permute.xlu0 %913  ;;  %v899_v53 = vpop.permute.xlu1 %898  ;;  %v572_v61 = vsel %vm1029_vm1, %v571_v51, 0.0  ;;  %v573_v7 = vsel %vm1033_vm3, %v568_v54, 0.0  ;;  %v546_v11 = vsel %vm1033_vm3, %v541_v59, 0.0  ;;  %v545_v22 = vsel %vm1029_vm1, %v544_v60, 0.0 }
 0x1f5   : > { %v916_v55 = vunpack.i.h.bf16 %v914_v52  ;;  %v915_v56 = vunpack.i.l.bf16 %v914_v52  ;;  %v901_v57 = vunpack.i.h.bf16 %v899_v53  ;;  %v900_v58 = vunpack.i.l.bf16 %v899_v53 }
 0x1f6   : > { %v618_v18 = vrot.slane %v572_v61, 4  ;;  %v619_v20 = vrot.slane %v573_v7, 4 }
 0x1f7   : > { %v578_v62 = vsel %vm366_vm7, %v916_v55, %v915_v56  ;;  %v581_v63 = vsel %vm366_vm7, %v915_v56, 0.0  ;;  %v553_v3 = vsel %vm332_vm5, 0.0, %v900_v58  ;;  %v551_v6 = vsel %vm332_vm5, %v900_v58, %v901_v57 }
 0x1f8   : > { %v582_v2 = vsel %vm1037_vm6, %v578_v62, 0.0  ;;  %v924_v4 = vpop.permute.xlu0 %923  ;;  %v909_v5 = vpop.permute.xlu1 %908  ;;  %v583_v8 = vsel %vm1046_vm9, %v581_v63, 0.0  ;;  %v612_v9 = vrot.slane %v553_v3, 4  ;;  %v613_v17 = vrot.slane %v551_v6, 4 }
 0x1f9   : > { %v926_v10 = vunpack.i.h.bf16 %v924_v4  ;;  %v925_v12 = vunpack.i.l.bf16 %v924_v4  ;;  %v911_v13 = vunpack.i.h.bf16 %v909_v5  ;;  %v910_v15 = vunpack.i.l.bf16 %v909_v5 }
 0x1fa   : > { %v624_v19 = vrot.slane %v582_v2, 4  ;;  %v625_v23 = vrot.slane %v583_v8, 4  ;;  %v633_v27 = vsel %vm426_vm8, %v545_v22, %v612_v9  ;;  %v634_v34 = vsel %vm426_vm8, %v546_v11, %v613_v17 }
 0x1fb   : > { %v561_v24 = vsel %vm340_vm4, 0.0, %v910_v15  ;;  %v558_v26 = vsel %vm340_vm4, %v910_v15, %v911_v13  ;;  %v588_v29 = vsel %vm377_vm11, %v926_v10, %v925_v12  ;;  %v591_v33 = vsel %vm377_vm11, %v925_v12, 0.0 }
 0x1fc   : > { %v919_v25 = vpop.permute.xlu1 %918  ;;  %v563_v32 = vsel %vm1046_vm9, %v558_v26, 0.0  ;;  %v562_v36 = vsel %vm1037_vm6, %v561_v24, 0.0  ;;  %v593_v47 = vsel %vm1033_vm3, %v591_v33, 0.0  ;;  %v592_v48 = vsel %vm1029_vm1, %v588_v29, 0.0  ;;  %v602_v55 = vpop.permute.xlu0 %601 }
 0x1fd   : > { %v921_v30 = vunpack.i.h.bf16 %v919_v25  ;;  %v920_v31 = vunpack.i.l.bf16 %v919_v25  ;;  %v636_v35 = vsel %vm426_vm8, %v563_v32, %v619_v20  ;;  %v635_v42 = vsel %vm426_vm8, %v562_v36, %v618_v18 }
 0x1fe   : > { %v829_v41 = vpack.c.bf16 %v636_v35, %v634_v34  ;;  %v831_v46 = vpack.c.bf16 %v635_v42, %v633_v27  ;;  %v638_v49 = vsel %vm426_vm8, %v1103_v40, %v625_v23  ;;  %v637_v51 = vsel %vm426_vm8, %v1101_v39, %v624_v19  ;;  %v641_v39 = vld [vmem:[%s1196_s4] sm:$0xf] }
 0x1ff   : > { %v598_v37 = vsel %vm388_vm10, %v921_v30, %v920_v31  ;;  %v600_v38 = vsel %vm388_vm10, %v920_v31, 0.0 }
 0x200   : > { %v629_v43 = vrot.slane %v598_v37, 4  ;;  %v630_v44 = vrot.slane %v600_v38, 4  ;;  %v604_v45 = vpop.permute.xlu1 %603  ;;  %830 = vmatprep.subr.bf16.mxu1 %v829_v41 }
 0x201   : > { %832 = vmatpush1.bf16.msra.mxu1 %v831_v46  ;;  %v608_v53 = vsel %vm396_vm12, %v604_v45, 0.0  ;;  %v605_v14 = vsel %vm396_vm12, %v602_v55, %v604_v45 }
 0x202   : > { %v640_v50 = vsel %vm426_vm8, %v593_v47, %v630_v44  ;;  %v639_v52 = vsel %vm426_vm8, %v592_v48, %v629_v43  ;;  %v610_v56 = vsel %vm1046_vm9, %v608_v53, 0.0  ;;  %v609_v40 = vsel %vm1037_vm6, %v605_v14, 0.0 }
 0x203   : > { %v833_v54 = vpack.c.bf16 %v640_v50, %v638_v49  ;;  %v835_v16 = vpack.c.bf16 %v639_v52, %v637_v51 }
 0x205   : > { %834 = vmatprep.subr.bf16.mxu1 %v833_v54 }
 0x206   : > { %836 = vmatpush1.bf16.msra.mxu1 %v835_v16 }
 0x207   : > { %814 = vmatprep.subr.msk.mxu1 %vm426_vm8, %v610_v56 }
 0x20a   : > { %815 = vmatpush1.msk.msra.mxu1 %vm426_vm8, %v609_v40 }
 0x20b   : > { %816 = vmatmul.mubr.msk.f32.vlgmr.msra.gmra.mrb[0].mxu1 %vm436_vm13, %v641_v39 }
 0x20d   : > { %v734_v60 = vpop.permute.xlu0 %733 }
 0x211   : > { %v726_v57 = vpop.permute.xlu1 %725 }
 0x2de   : > { %v717_v58 = vpop.f32.mrb[0].mxu1 }
 0x2df   : > { %v728_v59 = vmul.f32 %v726_v57, %v717_v58  ;;  %v719_v28 = vpop.f32.mrb[1].mxu1 }
 0x2e0   : > { %v729_v61 = vmul.f32 %v726_v57, %v719_v28 }
 0x2e1   : > { %v736_v62 = vadd.f32 %v734_v60, %v728_v59 }
 0x2e2   : > { %v737_v63 = vadd.f32 %v734_v60, %v729_v61 }
 0x2e3   : > { %v738_v2 = vadd.f32 %v736_v62, %v1002_v0 }
 0x2e4   : > { %v739_v3 = vadd.f32 %v737_v63, %v1006_v1 }
 0x2e5   : > { %v740_v4 = vmax.f32 %v738_v2, 0.0 }
 0x2e6   : > { %v741_v21 = vmax.f32 %v739_v3, 0.0 }
 0x2e8   : > { %v744_v5 = vcombine.low %v740_v4, %v741_v21 }
 0x2ea   : > { %746 = vst [vmem:[%s278_s9] sm:$0xff] %v744_v5 }
 0x2eb PF: > { %s17_s24 = sadd.s32 1, %s934_s24  }
 0x2ec   : > { %p14_p4 = scmp.ge.s32.totalorder %s17_s24, 4  }
 0x2ee   :  { %16 = sbr.rel (!%p14_p4) target bundleno = 1 (0x1), region = 78 }

</bundles_post_ra>
